<compile_context>
chip_gen: v5e
topology: v5e:2x2
jax: 0.10.0
libtpu: 0.0.40
codegen_flags: <defaults>
</compile_context>

<pallas_src>
import jax
import jax.numpy as jnp
from jax.experimental import pallas as pl
from jax.experimental.pallas import tpu as pltpu

W0 = 30.0  # matches Sine(w0=30.0)

LANE = 128
SUBLANE = 8
_TARGET_BLOCK_BYTES = 2 * 1024 * 1024  # ~2 MiB per block


def _sine_kernel(x_ref, o_ref):
    # Elementwise sin(w0 * x): multiply on the VPU, sin via range-reduction
    # polynomial. Compute in f32, cast back to storage dtype on store.
    x = x_ref[...].astype(jnp.float32)
    o_ref[...] = jnp.sin(W0 * x).astype(o_ref.dtype)


def _round_up(a, b):
    return -(-a // b) * b


def sine(x):
    """Apply sin(W0 * x) elementwise via a Pallas TPU kernel (any shape/float dtype)."""
    orig_shape = x.shape
    dtype = x.dtype
    n = x.size
    if n == 0:
        return x

    itemsize = jnp.dtype(dtype).itemsize
    # Second-minor (sublane) multiple for a block: 8 for 32-bit, 16 for 16-bit,
    # 32 for 8-bit packed dtypes.
    sub = SUBLANE * max(1, 4 // itemsize)

    # ---- flatten to a lane-dense (rows, 128) slab --------------------------
    nrows = -(-n // LANE)
    padded_n = nrows * LANE
    flat = jnp.reshape(x, (-1,))
    needs_pad = padded_n != n
    if needs_pad:
        # Slow path: one minimal pad to the next multiple of 128 only.
        flat = jnp.pad(flat, (0, padded_n - n))
    x2d = jnp.reshape(flat, (nrows, LANE))

    # ---- choose block size --------------------------------------------------
    if nrows <= sub:
        # Tiny input: a single full-array block (satisfies the (8,128) rule via
        # "block shape equals full array dims").
        block_rows = nrows
        grid = (1,)
    else:
        # Target ~2 MiB blocks, but keep at least ~4 grid steps so the parallel
        # axis can be sharded across TensorCores on v7x.
        target_rows = max(sub, _TARGET_BLOCK_BYTES // (LANE * itemsize))
        quarter_rows = _round_up(-(-nrows // 4), sub)
        block_rows = max(sub, min(_round_up(target_rows, sub), quarter_rows))
        grid = (pl.cdiv(nrows, block_rows),)  # partial last block handled by Pallas

    out2d = pl.pallas_call(
        _sine_kernel,
        out_shape=jax.ShapeDtypeStruct((nrows, LANE), dtype),
        grid_spec=pltpu.PrefetchScalarGridSpec(
            num_scalar_prefetch=0,
            grid=grid,
            # TODO(synk): if a profile shows exposed DMA, add
            # pipeline_mode=pl.Buffered(3) on the input spec instead of
            # shrinking the block.
            in_specs=[pl.BlockSpec((block_rows, LANE), lambda i: (i, 0))],
            out_specs=pl.BlockSpec((block_rows, LANE), lambda i: (i, 0)),
        ),
        compiler_params=pltpu.CompilerParams(
            dimension_semantics=("parallel",),
        ),
    )(x2d)

    if needs_pad:
        out_flat = jnp.reshape(out2d, (-1,))[:n]
        return jnp.reshape(out_flat, orig_shape)
    return jnp.reshape(out2d, orig_shape)


if __name__ == "__main__":
    key = jax.random.PRNGKey(0)
    # Small NCHW-like input consistent with typical usage of the module.
    x = jax.random.normal(key, (2, 4, 16, 16), dtype=jnp.float32)

    y = jax.block_until_ready(sine(x))

    # Correctness check against plain JAX reference.
    y_ref = jnp.sin(W0 * x)
    assert y.shape == x.shape and y.dtype == x.dtype
    assert jnp.allclose(y, y_ref, atol=1e-5, rtol=1e-5)

    # Also exercise the non-128-multiple (pad) path with a tiny odd shape.
    x_odd = jax.random.normal(jax.random.PRNGKey(1), (3, 5, 7), dtype=jnp.float32)
    y_odd = jax.block_until_ready(sine(x_odd))
    assert jnp.allclose(y_odd, jnp.sin(W0 * x_odd), atol=1e-5, rtol=1e-5)

    print("KERNEL_OK")
</pallas_src>

<mosaic_0001>
module attributes {stable_mosaic.version = 11 : i64} {
  func.func @_sine_kernel(%arg0: i32, %arg1: memref<8x128xf32, #tpu.memory_space<vmem>>, %arg2: memref<8x128xf32, #tpu.memory_space<vmem>>) attributes {dimension_semantics = [#tpu.dimension_semantics<parallel>], iteration_bounds = array<i64: 2>, scalar_prefetch = 0 : i64, scratch_operands = 0 : i64, tpu.core_type = #tpu.core_type<tc>, window_params = [{transform_indices = @transform_0, window_bounds = array<i64: 8, 128>}, {transform_indices = @transform_1, window_bounds = array<i64: 8, 128>}]} {
    %c0 = arith.constant 0 : index
    %c0_0 = arith.constant 0 : index
    %0 = vector.load %arg1[%c0, %c0_0] : memref<8x128xf32, #tpu.memory_space<vmem>>, vector<8x128xf32>
    %cst = arith.constant 3.000000e+01 : f32
    %1 = vector.broadcast %cst : f32 to vector<8x128xf32>
    %2 = arith.mulf %1, %0 : vector<8x128xf32>
    %3 = math.sin %2 : vector<8x128xf32>
    %c0_1 = arith.constant 0 : index
    %c0_2 = arith.constant 0 : index
    %4 = vector.load %arg2[%c0_1, %c0_2] : memref<8x128xf32, #tpu.memory_space<vmem>>, vector<8x128xf32>
    tpu.vector_store %arg2[%c0_1, %c0_2], %3 {strides = array<i32>} : memref<8x128xf32, #tpu.memory_space<vmem>>, vector<8x128xf32>,
    return
  }
  func.func @transform_0(%arg0: i32) -> (i32, i32) {
    %c0_i32 = arith.constant 0 : i32
    %c0_i32_0 = arith.constant 0 : i32
    return %arg0, %c0_i32 : i32, i32
  }
  func.func @transform_1(%arg0: i32) -> (i32, i32) {
    %c0_i32 = arith.constant 0 : i32
    %c0_i32_0 = arith.constant 0 : i32
    return %arg0, %c0_i32 : i32, i32
  }
}

</mosaic_0001>

<bundles_post_ra>
// kernel: tpu_custom_call.1
= control target key start
LH: loop header
LB: loop body
LE: loop exit
PB: predicated region body
PF: predicated region fallthrough
CT: control target
= control target key end

     0   :  { %6 = vsyncpa [#allocation3], 0  ;;  %s738_s0 = inlined_call_operand.hbm [shape: f32[16,128], index: 0, kind: input, shape index: {}]   ;;  %s739_s1 = inlined_call_operand.hbm [shape: f32[16,128], index: 1, kind: output, shape index: {}]  }
   0x1   :  { %8 = vsyncpa [#allocation3 + $0x1], 0 }
   0x2   :  { %9 = vsyncpa [#allocation4], 0 }
   0x3   :  { %11 = vsyncpa [#allocation4 + $0x1], 0  ;;  %s561_s6 = smov 0   ;;  %s563_s7 = smov 0  }
   0x4   :  { %s565_s8 = smov 0   ;;  %s567_s9 = smov 0  }
   0x5 LB: > { %s582_s10 = sadd.s32 4294967295, %s542_s9   ;;  %s378_s11 = sadd.s32 4294967294, %s542_s9   ;;  %s542_s9 = sphi %s567_s9, %s749_s9   ;;  %s538_s8 = sphi %s565_s8, %s748_s8   ;;  %s534_s7 = sphi %s563_s7, %s747_s7   ;;  %s530_s6 = sphi %s561_s6, %s746_s6  }
   0x6   : > { %s586_s12 = sadd.s32 1, %s542_s9   ;;  %s24_s13 = sadd.s32 1, %s538_s8 }
   0x7   : > { %s21_s14 = ssub.s32 %s542_s9, %s586_s12  ;;  %p31_p0 = scmp.ne.s32.totalorder %s538_s8, %s534_s7 }
   0x8   : > { %p22_p1 = scmp.eq.s32.totalorder %s21_s14, 0  ;;  %p32_p2 = scmp.eq.s32.totalorder %s542_s9, 0 }
   0x9   : > { %p37_p3 = scmp.ne.s32.totalorder %s534_s7, %s530_s6  ;;  %p38_p4 = scmp.eq.s32.totalorder %s582_s10, 0 }
   0xa   : > { %s598_s15 = scalar_select %p22_p1, %s538_s8, %s24_s13  }
   0xb   : > { %p600_p5 = por %p32_p2, %p31_p0  ;;  %p604_p6 = por %p38_p4, %p37_p3 }
   0xc   : > { %p61_p7 = scmp.eq.s32.totalorder %s582_s10, 1  ;;  %p67_p8 = scmp.eq.s32.totalorder %s378_s11, 1 }
   0xd   : > { %p405_p10 = scmp.lt.s32.totalorder %s542_s9, 2  ;;  %s87_s20 = sand.u32 1, %s538_s8  }
   0xe   : > { %p611_p11 = por %p61_p7, %p31_p0  ;;  %p615_p12 = por %p67_p8, %p37_p3 }
   0xf   : > { %s382_s21 = sshll.u32 %s542_s9, 3  ;;  %s381_s22 = sshll.u32 %s87_s20, 3 }
  0x10   : > { %s95_s25 = scalar_lea.hbm %s738_s0, %s382_s21  ;;  %s91_s27 = scalar_lea.vmem [#allocation2], %s381_s22 }
  0x11   : > { %s97_s26 = sshll.u32 %s95_s25, 4  ;;  %s99_s28 = sshll.u32 %s91_s27, 4  ;;  %s98_s26 = int_to_ptr.hbm [resolvable:$true] %s97_s26  ;;  %s100_s28 = int_to_ptr.vmem [resolvable:$true] %s99_s28 }
  0x12   : > { %p626_p13 = pnand %p405_p10, %p600_p5  ;;  %p383_p0 = scmp.ge.s32.totalorder %s542_s9, 1 }
  0x13   : > { %p104_p1 = scmp.lt.s32.totalorder %s542_s9, 3  ;;  %s88_s30 = scalar_lea.sflag [#allocation3], %s87_s20 }
  0x14   : > { %s446_s2 = sshra.s32 %s98_s26, 4  ;;  %p450_p3 = pneg %p626_p13  ;;  %s447_s2 = int_to_ptr.hbm [resolvable:$true] %s446_s2 }
  0x15   : > { %s448_s3 = scalar_lea.hbm %s447_s2, 8  ;;  %s453_s11 = scalar_lea.hbm %s738_s0, 16 }
  0x16   : > { %p449_p2 = scmp.ne.s32.totalorder %s447_s2, %s448_s3  ;;  %p454_p5 = scmp.lt.s32.totalorder %s447_s2, %s738_s0 }
  0x17   : > { %p455_p8 = scmp.lt.s32.totalorder %s453_s11, %s448_s3 }
  0x18   : > { %p451_p4 = pnand %p450_p3, %p449_p2 }
  0x19   : > { %p456_p10 = por %p455_p8, %p454_p5 }
  0x1a   : > { %p452_p7 = pneg %p451_p4 }
  0x1c   : > { %p457_p9 = pnand %p456_p10, %p452_p7 }
  0x1e   : > { %460 = shalt.err (!%p457_p9)
}
  0x1f   : > { %400 = dma.hbm_to_vmem [thread:$0]  (!%p626_p13), %s98_s26, 128, %s100_s28, %s88_s30  }
  0x20   : > { %p105_p2 = pnand %p383_p0, %p104_p1 }
  0x21   : > { %s647_s16 = sand.u32 (!%p105_p2), 1, %s534_s7  }
  0x22   : > { %108 = sbr.rel (%p105_p2) target bundleno = 142 (0x8e), region = 24  ;;  %s384_s20 = sshll.u32 (!%p105_p2), %s647_s16, 3 }
  0x23   : > { %s111_s21 = scalar_lea.sflag (!%p105_p2), [#allocation3], %s647_s16  ;;  %s114_s22 = scalar_lea.vmem (!%p105_p2), [#allocation2], %s384_s20 }
  0x27   : > { %521 = dma.done.wait (%p604_p6), %s111_s21, 128  }
  0x28   : > { %523 = vsyncadd (%p604_p6), %s111_s21, 4294967168  ;;  %v134_v0 = vld [vmem:[%s114_s22] sm:$0xff]  ;;  %v544_v13 = vmov 683565275   ;;  %v545_v15 = vmov 2475754826  }
  0x29   : > { %v657_v1 = vmul.f32 30.0, %v134_v0  ;;  %v546_v17 = vmov 2131351028   ;;  %v547_v19 = vmov 2102212464   ;;  %s390_s17 = sshll.u32 %s582_s10, 3 }
  0x2a   : > { %v548_v21 = vmov 920167782   ;;  %v549_v27 = vmov 1326507024   ;;  %s303_s25 = scalar_lea.hbm %s739_s1, %s390_s17  ;;  %s133_s26 = scalar_lea.vmem [#allocation5], %s384_s20 }
  0x2b   : > { %v139_v2 = vand.u32 2139095040, %v657_v1  ;;  %v136_v4 = vand.u32 2147483647, %v657_v1  ;;  %vm138_vm12 = vcmp.lt.s32.totalorder %v657_v1, 0  ;;  %s305_s27 = sshll.u32 %s133_s26, 4  ;;  %s307_s28 = sshll.u32 %s303_s25, 4  ;;  %s306_s27 = int_to_ptr.vmem [resolvable:$true] %s305_s27  ;;  %s308_s28 = int_to_ptr.hbm [resolvable:$true] %s307_s28 }
  0x2c   : > { %s293_s10 = scalar_lea.sflag [#allocation4], %s647_s16  ;;  %s490_s29 = sshra.s32 %s308_s28, 4  ;;  %s491_s29 = int_to_ptr.hbm [resolvable:$true] %s490_s29 }
  0x2d   : > { %v140_v3 = vshrl.u32 %v139_v2, 23  ;;  %v143_v7 = vand.u32 8388607, %v136_v4  ;;  %v550_v2 = vmov 0   ;;  %vm137_vm13 = vcmp.le.f32.partialorder %v136_v4, 0.7853982  ;;  %p497_p0 = scmp.lt.s32.totalorder %s491_s29, %s739_s1 }
  0x2e   : > { %s492_s30 = scalar_lea.hbm %s491_s29, 8  ;;  %s496_s4 = scalar_lea.hbm %s739_s1, 16 }
  0x2f   : > { %v386_v5 = vadd.s32 4294967169, %v140_v3  ;;  %v144_v10 = vor.u32 8388608, %v143_v7  ;;  %p493_p6 = scmp.ne.s32.totalorder %s491_s29, %s492_s30  ;;  %p498_p1 = scmp.lt.s32.totalorder %s496_s4, %s492_s30 }
  0x31   : > { %v146_v6 = vadd.s32 1, %v386_v5  ;;  %v666_v29 = vshll.u32 %v144_v10, 8  ;;  %p494_p9 = pnand %p493_p6, %p611_p11  ;;  %p499_p3 = por %p498_p1, %p497_p0 }
  0x33   : > { %vm147_vm0 = vcmp.gt.s32.totalorder %v146_v6, 0  ;;  %v185_v41 = vand.u32 65535, %v666_v29  ;;  %v186_v42 = vshrl.u32 %v666_v29, 16  ;;  %p495_p13 = pneg %p494_p9 }
  0x34   : > { %v148_v8 = vsel %vm147_vm0, %v146_v6, 0 }
  0x35   : > { %v150_v9 = vand.u32 31, %v148_v8  ;;  %v663_v11 = vshrl.u32 %v148_v8, 5  ;;  %p500_p4 = pnand %p499_p3, %p495_p13 }
  0x37   : > { %v151_v12 = vsub.s32 32, %v150_v9  ;;  %v153_v14 = vshll.u32 %v544_v13, %v150_v9  ;;  %v156_v16 = vshll.u32 %v545_v15, %v150_v9  ;;  %v159_v18 = vshll.u32 %v546_v17, %v150_v9 }
  0x38   : > { %v162_v20 = vshll.u32 %v547_v19, %v150_v9  ;;  %v165_v22 = vshll.u32 %v548_v21, %v150_v9  ;;  %vm168_vm1 = vcmp.lt.s32.totalorder %v663_v11, 1  ;;  %vm171_vm2 = vcmp.lt.s32.totalorder %v663_v11, 4 }
  0x39   : > { %v154_v23 = vshrl.u32 %v545_v15, %v151_v12  ;;  %v157_v24 = vshrl.u32 %v546_v17, %v151_v12  ;;  %v160_v25 = vshrl.u32 %v547_v19, %v151_v12  ;;  %v163_v26 = vshrl.u32 %v548_v21, %v151_v12 }
  0x3a   : > { %v166_v28 = vshrl.u32 %v549_v27, %v151_v12  ;;  %vm170_vm3 = vcmp.lt.s32.totalorder %v663_v11, 3  ;;  %vm169_vm4 = vcmp.lt.s32.totalorder %v663_v11, 2  ;;  %v152_v49 = vshrl.u32 %v544_v13, %v151_v12 }
  0x3b   : > { %v155_v30 = vor.u32 %v154_v23, %v153_v14  ;;  %v158_v31 = vor.u32 %v157_v24, %v156_v16  ;;  %v161_v32 = vor.u32 %v160_v25, %v159_v18  ;;  %v164_v33 = vor.u32 %v163_v26, %v162_v20 }
  0x3c   : > { %v167_v34 = vor.u32 %v166_v28, %v165_v22 }
  0x3d   : > { %v176_v35 = vsel %vm168_vm1, %v155_v30, %v158_v31  ;;  %v180_v36 = vsel %vm168_vm1, %v158_v31, %v161_v32  ;;  %v177_v37 = vsel %vm171_vm2, %v164_v33, 920167782  ;;  %v172_v62 = vsel %vm168_vm1, %v152_v49, %v155_v30 }
  0x3e   : > { %v181_v38 = vsel %vm171_vm2, %v167_v34, 1326507024  ;;  %v178_v39 = vsel %vm170_vm3, %v161_v32, %v177_v37  ;;  %v173_v0 = vsel %vm171_vm2, %v161_v32, 2102212464  ;;  %vm279_vm1 = vweird.f32 %v657_v1 }
  0x3f   : > { %v182_v40 = vsel %vm170_vm3, %v164_v33, %v181_v38  ;;  %v179_v43 = vsel %vm169_vm4, %v176_v35, %v178_v39  ;;  %v174_v13 = vsel %vm170_vm3, %v158_v31, %v173_v0 }
  0x40   : > { %v183_v44 = vsel %vm169_vm4, %v180_v36, %v182_v40  ;;  %v209_v47 = vand.u32 65535, %v179_v43  ;;  %v210_v48 = vshrl.u32 %v179_v43, 16  ;;  %v175_v21 = vsel %vm169_vm4, %v172_v62, %v174_v13 }
  0x41   : > { %v187_v45 = vand.u32 65535, %v183_v44  ;;  %v188_v46 = vshrl.u32 %v183_v44, 16  ;;  %v229_v25 = vmul.u32 %v666_v29, %v175_v21 }
  0x42   : > { %v211_v53 = vmul.u32 %v209_v47, %v185_v41  ;;  %v212_v54 = vmul.u32 %v210_v48, %v185_v41  ;;  %v213_v55 = vmul.u32 %v209_v47, %v186_v42  ;;  %v214_v59 = vmul.u32 %v210_v48, %v186_v42 }
  0x43   : > { %v189_v50 = vmul.u32 %v187_v45, %v185_v41  ;;  %v190_v51 = vmul.u32 %v188_v46, %v185_v41  ;;  %v191_v52 = vmul.u32 %v187_v45, %v186_v42  ;;  %v192_v56 = vmul.u32 %v188_v46, %v186_v42 }
  0x44   : > { %v215_v60 = vshll.u32 %v212_v54, 16  ;;  %v217_v61 = vshll.u32 %v213_v55, 16  ;;  %v216_v10 = vshrl.u32 %v212_v54, 16  ;;  %v218_v17 = vshrl.u32 %v213_v55, 16 }
  0x45   : > { %v193_v57 = vshll.u32 %v190_v51, 16  ;;  %v195_v58 = vshll.u32 %v191_v52, 16  ;;  %v194_v6 = vshrl.u32 %v190_v51, 16  ;;  %v196_v14 = vshrl.u32 %v191_v52, 16 }
  0x46   : > { %vm219_vm6 = vc.u32 %v211_v53, %v215_v60  ;;  %v221_v5 = vadd.s32 %v215_v60, %v211_v53 }
  0x47   : > { %vm197_vm5 = vc.u32 %v189_v50, %v193_v57  ;;  %v199_v63 = vadd.s32 %v193_v57, %v189_v50  ;;  %v220_v8 = vsel %vm219_vm6, 1, %v550_v2 }
  0x48   : > { %v198_v3 = vsel %vm197_vm5, 1, %v550_v2  ;;  %v222_v12 = vadd.s32 %v220_v8, %v214_v59  ;;  %vm223_vm8 = vc.u32 %v221_v5, %v217_v61  ;;  %v225_v20 = vadd.s32 %v221_v5, %v217_v61 }
  0x49   : > { %v200_v7 = vadd.s32 %v198_v3, %v192_v56  ;;  %vm201_vm7 = vc.u32 %v199_v63, %v195_v58  ;;  %v224_v16 = vsel %vm223_vm8, 1, %v550_v2 }
  0x4a   : > { %v202_v9 = vsel %vm201_vm7, 1, %v550_v2  ;;  %v226_v18 = vadd.s32 %v224_v16, %v222_v12 }
  0x4b   : > { %v204_v15 = vadd.s32 %v202_v9, %v200_v7 }
  0x4c   : > { %v227_v22 = vadd.s32 %v226_v18, %v216_v10 }
  0x4d   : > { %v205_v19 = vadd.s32 %v204_v15, %v194_v6 }
  0x4e   : > { %v228_v24 = vadd.s32 %v227_v22, %v218_v17 }
  0x4f   : > { %v206_v23 = vadd.s32 %v205_v19, %v196_v14 }
  0x50   : > { %v232_v26 = vadd.s32 1, %v228_v24 }
  0x51   : > { %vm231_vm9 = vc.u32 %v206_v23, %v225_v20  ;;  %v230_v11 = vadd.s32 %v225_v20, %v206_v23 }
  0x52   : > { %v233_v27 = vsel %vm231_vm9, %v232_v26, %v228_v24 }
  0x53   : > { %v234_v28 = vadd.s32 %v233_v27, %v229_v25 }
  0x55   : > { %v235_v30 = vadd.s32 536870912, %v234_v28 }
  0x57   : > { %v236_v31 = vshrl.u32 %v235_v30, 30 }
  0x59   : > { %v237_v32 = vshll.u32 %v236_v31, 30  ;;  %v260_v49 = vsub.s32 4, %v236_v31 }
  0x5b   : > { %v238_v33 = vsub.s32 %v234_v28, %v237_v32  ;;  %v261_v52 = vsel %vm138_vm12, %v260_v49, %v236_v31 }
  0x5c   : > { %v263_v55 = vsel %vm137_vm13, 0, %v261_v52 }
  0x5d   : > { %vm239_vm10 = vcmp.lt.s32.totalorder %v238_v33, 0  ;;  %v240_v34 = vsub.s32 0, %v238_v33  ;;  %v280_v60 = vadd.s32 3, %v263_v55 }
  0x5f   : > { %v241_v35 = vsel %vm239_vm10, %v240_v34, %v238_v33  ;;  %v281_v2 = vand.u32 3, %v280_v60 }
  0x60   : > { %v242_v36 = vclz %v241_v35 }
  0x61   : > { %vm286_vm14 = vcmp.eq.s32.totalorder %v281_v2, 2  ;;  %vm283_vm15 = vcmp.eq.s32.totalorder %v281_v2, 0  ;;  %vm282_vm0 = vcmp.lt.s32.totalorder %v281_v2, 2 }
  0x62   : > { %v387_v37 = vadd.s32 4294967294, %v242_v36 }
  0x64   : > { %vm388_vm11 = vcmp.lt.s32.totalorder %v387_v37, 0 }
  0x65   : > { %v245_v38 = vsel %vm388_vm11, 0, %v387_v37 }
  0x66   : > { %v246_v39 = vsub.s32 32, %v245_v38  ;;  %v247_v40 = vshll.u32 %v238_v33, %v245_v38  ;;  %v250_v41 = vsub.s32 4294967266, %v245_v38 }
  0x68   : > { %v248_v29 = vshrl.u32 %v230_v11, %v246_v39  ;;  %v251_v42 = vadd.s32 127, %v250_v41 }
  0x6a   : > { %v249_v43 = vor.u32 %v248_v29, %v247_v40  ;;  %v252_v44 = vshll.u32 %v251_v42, 23 }
  0x6c   : > { %v253_v45 = vor.u32 4788187, %v252_v44  ;;  %v256_v46 = vcvt.s32.f32 %v249_v43 }
  0x6e   : > { %v254_v47 = vand.u32 2147483647, %v253_v45 }
  0x70   : > { %v257_v48 = vmul.f32 %v256_v46, %v254_v47 }
  0x72   : > { %v258_v50 = vxor.u32 2147483648, %v257_v48 }
  0x74   : > { %v259_v51 = vsel %vm138_vm12, %v258_v50, %v257_v48 }
  0x75   : > { %v262_v53 = vsel %vm137_vm13, %v657_v1, %v259_v51 }
  0x76   : > { %v264_v54 = vmul.f32 %v262_v53, %v262_v53 }
  0x78   : > { %v265_v56 = vmul.f32 -0.001358992, %v264_v54  ;;  %v272_v57 = vmul.f32 -0.00019511016, %v264_v54 }
  0x7a   : > { %v266_v58 = vadd.f32 0.041655596, %v265_v56  ;;  %v273_v59 = vadd.f32 0.008332121, %v272_v57 }
  0x7c   : > { %v267_v61 = vmul.f32 %v266_v58, %v264_v54  ;;  %v274_v62 = vmul.f32 %v273_v59, %v264_v54 }
  0x7e   : > { %v268_v63 = vadd.f32 -0.4999988, %v267_v61  ;;  %v275_v0 = vadd.f32 -0.16666654, %v274_v62 }
  0x80   : > { %v269_v4 = vmul.f32 %v268_v63, %v264_v54  ;;  %v276_v3 = vmul.f32 %v275_v0, %v264_v54 }
  0x82   : > { %v270_v5 = vadd.f32 1.0, %v269_v4  ;;  %v277_v6 = vadd.f32 1.0, %v276_v3 }
  0x84   : > { %v278_v7 = vmul.f32 %v277_v6, %v262_v53  ;;  %v287_v8 = vxor.u32 2147483648, %v270_v5 }
  0x86   : > { %v284_v9 = vxor.u32 2147483648, %v278_v7  ;;  %v288_v10 = vsel %vm286_vm14, %v287_v8, %v278_v7 }
  0x88   : > { %v285_v12 = vsel %vm283_vm15, %v270_v5, %v284_v9 }
  0x89   : > { %v289_v13 = vsel %vm282_vm0, %v285_v12, %v288_v10 }
  0x8a   : > { %v290_v14 = vsel %vm279_vm1, nan, %v289_v13 }
  0x8b   : > { %291 = vst [vmem:[%s133_s26] sm:$0xff] %v290_v14 }
  0x8c   : > { %503 = shalt.err (!%p500_p4)
}
  0x8d   : > { %395 = dma.vmem_to_hbm [thread:$0]  (%p611_p11), %s306_s27, 128, %s308_s28, %s293_s10  }
  0x8e PF: > { %s319_s13 = sand.u32 1, %s530_s6   ;;  %p745_p7 = scmp.ge.s32.totalorder %s542_s9, 2 }
  0x8f   : > { %s320_s14 = scalar_lea.sflag [#allocation4], %s319_s13 }
  0x90   : > { %p402_p5 = pnand %p745_p7, %p615_p12 }
  0x92   : > { %p403_p8 = pneg %p402_p5 }
  0x94   : > { %525 = dma.done.wait (%p403_p8), %s320_s14, 128  }
  0x95   : > { %527 = vsyncadd (%p403_p8), %s320_s14, 4294967168  ;;  %p14_p10 = scmp.ge.s32.totalorder %s586_s12, 4   ;;  %s746_s6 = smov %s534_s7 }
  0x96   : > { %s747_s7 = smov %s538_s8  ;;  %s748_s8 = smov %s598_s15 }
  0x97   : > { %s749_s9 = smov %s586_s12  ;;  %16 = sbr.rel (!%p14_p10) target bundleno = 5 (0x5), region = 69 }
  0x9c   :  { %326 = vsyncpa [#allocation3], 1 }
  0x9d   :  { %328 = vsyncpa [#allocation3 + $0x1], 1 }
  0x9e   :  { %329 = vsyncpa [#allocation4], 1 }
  0x9f   :  { %331 = vsyncpa [#allocation4 + $0x1], 1 }

</bundles_post_ra>
